<compile_context>
chip_gen: v6e
topology: v6e:2x2x1
jax: 0.10.0
libtpu: 0.0.40
codegen_flags: <defaults>
</compile_context>

<pallas_src>
import functools

import jax
import jax.numpy as jnp
from jax import lax
from jax.experimental import pallas as pl
from jax.experimental.pallas import tpu as pltpu

_LANES = 128
_SUBLANES = 8


# ---------------------------------------------------------------------------
# Planning helpers
# ---------------------------------------------------------------------------
def _round_up(x: int, m: int) -> int:
    return ((x + m - 1) // m) * m


def _row_align(*dtypes) -> int:
    """Sublane alignment for the block row count: 8 for 32-bit, 16 for 16-bit, 32 for 8-bit."""
    align = 8
    for dt in dtypes:
        isz = jnp.dtype(dt).itemsize
        if isz == 2:
            align = max(align, 16)
        elif isz == 1:
            align = max(align, 32)
    return align


def _plan(rows: int, row_align: int, max_tile_rows: int, want_splits: int):
    """Pick (num_splits, tiles_per_split, tile_rows). No divisibility requirements:
    overhanging / duplicated blocks are masked to zero inside the kernel."""
    want_splits = max(1, int(want_splits))
    max_tile_rows = max(row_align, (max_tile_rows // row_align) * row_align)
    tile_rows = min(max_tile_rows, _round_up(pl.cdiv(rows, want_splits), row_align))
    tiles_total = pl.cdiv(rows, tile_rows)
    num_splits = min(want_splits, tiles_total)
    tiles_per_split = pl.cdiv(tiles_total, num_splits)
    return num_splits, tiles_per_split, tile_rows


def _chunk_rows(tile_rows: int, row_align: int) -> int:
    """Rows processed per inner fori_loop iteration (keeps the working set in vregs)."""
    for c in (64, 32, 16, 8):
        if c % row_align == 0 and tile_rows % c == 0:
            return c
    return tile_rows


# ---------------------------------------------------------------------------
# Kernel
# ---------------------------------------------------------------------------
def _make_sum_kernel(*, n_inputs, tile_rows, chunk_rows, rows_total,
                     tiles_per_split, needs_mask, elemwise_fn):
    n_chunks = tile_rows // chunk_rows

    def kernel(*refs):
        in_refs = refs[:n_inputs]
        acc_ref = refs[n_inputs]          # (8, 128) f32 output block, resident across axis 1

        @pl.when(pl.program_id(1) == 0)
        def _init():
            acc_ref[...] = jnp.zeros_like(acc_ref)

        # Un-clamped logical block index (used only for the validity mask).
        block_idx = pl.program_id(0) * tiles_per_split + pl.program_id(1)
        block_row0 = block_idx * tile_rows

        def accumulate(c, part):
            r0 = c * chunk_rows
            if not isinstance(r0, int):
                r0 = pl.multiple_of(r0, chunk_rows)
            vals = [r[pl.ds(r0, chunk_rows), :].astype(jnp.float32) for r in in_refs]
            e = elemwise_fn(*vals)                                   # (chunk_rows, 128) f32
            if needs_mask:
                valid = rows_total - (block_row0 + c * chunk_rows)   # may be <= 0
                row_id = lax.broadcasted_iota(jnp.int32, (chunk_rows, _LANES), 0)
                e = jnp.where(row_id < valid, e, 0.0)
            # Sublane-group sum: pure VPU vreg adds, no XLU in the hot loop.
            return part + e.reshape(chunk_rows // _SUBLANES, _SUBLANES, _LANES).sum(axis=0)

        part = jnp.zeros((_SUBLANES, _LANES), jnp.float32)
        if n_chunks == 1:
            part = accumulate(0, part)
        else:
            part = lax.fori_loop(0, n_chunks, accumulate, part,
                                 unroll=min(n_chunks, 8))
        acc_ref[...] += part

    return kernel


def _streaming_sum(arrays, elemwise_fn, *, flops_per_elem, transc_per_elem,
                   max_tile_rows=2048, want_splits=2, input_buffers=2):
    """Sum_{all elements} elemwise_fn(*arrays) for (rows, 128) lane-dense f32/bf16 slabs."""
    rows = arrays[0].shape[0]
    for a in arrays:
        assert a.ndim == 2 and a.shape == (rows, _LANES), a.shape

    row_align = _row_align(*[a.dtype for a in arrays])
    num_splits, tiles_per_split, tile_rows = _plan(rows, row_align, max_tile_rows, want_splits)
    tiles_total = pl.cdiv(rows, tile_rows)
    covered = num_splits * tiles_per_split * tile_rows
    needs_mask = covered != rows
    chunk = _chunk_rows(tile_rows, row_align)

    if num_splits * tiles_per_split != tiles_total:
        # Rectangular grid has a few surplus steps: clamp them onto the last real block
        # (they are fully masked out in-kernel).
        def in_map(c, i):
            return (jnp.minimum(c * tiles_per_split + i, tiles_total - 1), 0)
    else:
        def in_map(c, i):
            return (c * tiles_per_split + i, 0)

    def out_map(c, i):
        return (c, 0)

    block_kwargs = {}
    if input_buffers != 2:
        # Deeper input pipelining if profiling shows exposed DMA at step boundaries.
        block_kwargs["pipeline_mode"] = pl.Buffered(input_buffers)

    n_elems = rows * _LANES
    cost = pl.CostEstimate(
        flops=int(flops_per_elem * n_elems),
        transcendentals=int(transc_per_elem * n_elems),
        bytes_accessed=int(sum(a.size * a.dtype.itemsize for a in arrays)
                           + num_splits * _SUBLANES * _LANES * 4),
    )

    kernel = _make_sum_kernel(
        n_inputs=len(arrays), tile_rows=tile_rows, chunk_rows=chunk,
        rows_total=rows, tiles_per_split=tiles_per_split,
        needs_mask=needs_mask, elemwise_fn=elemwise_fn)

    partials = pl.pallas_call(
        kernel,
        out_shape=jax.ShapeDtypeStruct((num_splits * _SUBLANES, _LANES), jnp.float32),
        grid=(num_splits, tiles_per_split),
        in_specs=[pl.BlockSpec((tile_rows, _LANES), in_map, **block_kwargs)
                  for _ in arrays],
        out_specs=pl.BlockSpec((_SUBLANES, _LANES), out_map),
        compiler_params=pltpu.CompilerParams(
            dimension_semantics=("parallel", "arbitrary")),
        cost_estimate=cost,
    )(*arrays)

    # Tiny finalize in plain JAX: one cross-lane/sublane reduce of the per-split partials.
    return jnp.sum(partials)


# ---------------------------------------------------------------------------
# Elementwise bodies
# ---------------------------------------------------------------------------
def _bce_pair_sum_elemwise(zr, zi, y):
    # bce(zr, y) + bce(zi, y), with the two softplus terms fused into a single log:
    #   log1p(e_r) + log1p(e_i) = log((1 + e_r) * (1 + e_i)),  e_* = exp(-|x|) in (0, 1].
    er = jnp.exp(-jnp.abs(zr))
    ei = jnp.exp(-jnp.abs(zi))
    lin = jnp.maximum(zr, 0.0) + jnp.maximum(zi, 0.0) - (zr + zi) * y
    return lin + jnp.log((1.0 + er) * (1.0 + ei))


def _pos_softplus_elemwise(x):
    # Label-free half of BCE-with-logits: max(x, 0) + log1p(exp(-|x|)).
    return jnp.maximum(x, 0.0) + jnp.log1p(jnp.exp(-jnp.abs(x)))


def _reference_loss(z_real, z_imag, label):
    def bce_mean(x, y):
        x = x.astype(jnp.float32)
        y = y.astype(jnp.float32)
        return jnp.mean(jnp.maximum(x, 0.0) - x * y + jnp.log1p(jnp.exp(-jnp.abs(x))))
    return 0.5 * (bce_mean(z_real, label) + bce_mean(z_imag, label))


# ---------------------------------------------------------------------------
# Public entry points
# ---------------------------------------------------------------------------
def mean_bce_with_logits(z_real, z_imag, label, *, max_tile_rows=2048,
                         want_splits=2, input_buffers=2, jnp_fallback_below=0):
    """0.5 * (BCEWithLogits(z_real, label) + BCEWithLogits(z_imag, label)), mean reduction.
    12 B/elem HBM traffic (the ideal for separate real/imag inputs)."""
    assert z_real.shape == z_imag.shape == label.shape
    n = z_real.size
    if n < jnp_fallback_below or n % _LANES != 0:
        # Tiny or awkward sizes: kernel launch overhead exceeds the work / lane padding
        # would be needed -> plain fused XLA is strictly faster and always correct.
        return _reference_loss(z_real, z_imag, label)
    rows = n // _LANES
    total = _streaming_sum(
        (z_real.reshape(rows, _LANES),
         z_imag.reshape(rows, _LANES),
         label.reshape(rows, _LANES)),
        _bce_pair_sum_elemwise,
        flops_per_elem=16, transc_per_elem=3,
        max_tile_rows=max_tile_rows, want_splits=want_splits,
        input_buffers=input_buffers)
    return total * (0.5 / n)


@functools.lru_cache(maxsize=None)
def _complex_bitcast_ok() -> bool:
    """Probe (once, eagerly) whether complex64 -> interleaved f32 bitcast works here."""
    try:
        probe = jnp.zeros((_LANES,), jnp.complex64)
        flat = jax.lax.bitcast_convert_type(probe, jnp.float32)
        jax.block_until_ready(flat)
        return flat.shape == (_LANES, 2)
    except Exception:
        return False


def mean_bce_with_logits_complex(z, label, *, max_tile_rows=2048,
                                 want_splits=2, input_buffers=2, jnp_fallback_below=0):
    """Matches the PyTorch module interface: z is complex, label is real."""
    assert jnp.iscomplexobj(z)
    assert z.shape == label.shape
    n = z.size
    n_flat = 2 * n

    if (n < jnp_fallback_below) or (n_flat % _LANES != 0) or (not _complex_bitcast_ok()):
        # Fallback: real/imag extraction feeding the fused 3-input kernel (28 B/elem),
        # or pure jnp for tiny inputs.
        return mean_bce_with_logits(jnp.real(z), jnp.imag(z), label,
                                    max_tile_rows=max_tile_rows,
                                    want_splits=want_splits,
                                    input_buffers=input_buffers,
                                    jnp_fallback_below=jnp_fallback_below)

    # No jnp.real/jnp.imag HBM materialization: feed the interleaved f32 bitcast view of
    # the complex buffer straight to the kernel for the label-free part of the loss
    # (order of (re, im) within each pair is irrelevant for this term).
    rows = n_flat // _LANES
    x = jax.lax.bitcast_convert_type(z, jnp.float32).reshape(rows, _LANES)
    yfree = _streaming_sum(
        (x,), _pos_softplus_elemwise,
        flops_per_elem=6, transc_per_elem=2,
        max_tile_rows=max_tile_rows, want_splits=want_splits,
        input_buffers=input_buffers)

    # Label-coupled linear term: one fused XLA reduction over z and label (12 B/elem).
    # TODO(synk): fold this into the Pallas kernel via an in-register lane de-interleave
    # of the (re, im) pairs to reach the 12 B/elem total roofline.
    lin = jnp.sum((jnp.real(z) + jnp.imag(z)).astype(jnp.float32)
                  * label.astype(jnp.float32))

    return (yfree - lin) * (0.5 / n)


# ---------------------------------------------------------------------------
# Demo / correctness check
# ---------------------------------------------------------------------------
if __name__ == "__main__":
    key = jax.random.PRNGKey(0)
    k1, k2, k3 = jax.random.split(key, 3)

    # z is complex NCHW [2, 4, 16, 16]; label is real-valued targets in [0, 1].
    shape = (2, 4, 16, 16)
    z_real = jax.random.normal(k1, shape, dtype=jnp.float32)
    z_imag = jax.random.normal(k2, shape, dtype=jnp.float32)
    label = jax.random.uniform(k3, shape, dtype=jnp.float32)
    z = z_real + 1j * z_imag  # complex64

    ref = jax.block_until_ready(_reference_loss(z_real, z_imag, label))

    # Path 1: separate real/imag arrays (fused 3-input kernel, 12 B/elem).
    out_split = jax.block_until_ready(mean_bce_with_logits(z_real, z_imag, label))
    # Path 2: complex input, matching the PyTorch module's forward(z, label).
    out_cplx = jax.block_until_ready(mean_bce_with_logits_complex(z, label))

    assert jnp.allclose(out_split, ref, atol=1e-5, rtol=1e-5), (out_split, ref)
    assert jnp.allclose(out_cplx, ref, atol=1e-5, rtol=1e-5), (out_cplx, ref)

    print("KERNEL_OK")
</pallas_src>

<mosaic_0001>
module attributes {stable_mosaic.version = 11 : i64} {
  func.func @kernel(%arg0: i32, %arg1: i32, %arg2: memref<8x128xf32, #tpu.memory_space<vmem>>, %arg3: memref<8x128xf32, #tpu.memory_space<vmem>>, %arg4: memref<8x128xf32, #tpu.memory_space<vmem>>, %arg5: memref<8x128xf32, #tpu.memory_space<vmem>>) attributes {dimension_semantics = [#tpu.dimension_semantics<parallel>, #tpu.dimension_semantics<arbitrary>], iteration_bounds = array<i64: 2, 1>, scalar_prefetch = 0 : i64, scratch_operands = 0 : i64, tpu.core_type = #tpu.core_type<tc>, window_params = [{transform_indices = @transform_0, window_bounds = array<i64: 8, 128>}, {transform_indices = @transform_1, window_bounds = array<i64: 8, 128>}, {transform_indices = @transform_2, window_bounds = array<i64: 8, 128>}, {transform_indices = @transform_3, window_bounds = array<i64: 8, 128>}]} {
    %c0_i32 = arith.constant 0 : i32
    %0 = arith.cmpi eq, %arg1, %c0_i32 : i32
    %1 = arith.extui %0 : i1 to i32
    %c0_i32_0 = arith.constant 0 : i32
    %2 = arith.cmpi ne, %1, %c0_i32_0 : i32
    scf.if %2 {
      %cst_17 = arith.constant 0.000000e+00 : f32
      %36 = vector.broadcast %cst_17 : f32 to vector<8x128xf32>
      %c0_18 = arith.constant 0 : index
      %c0_19 = arith.constant 0 : index
      %37 = vector.load %arg5[%c0_18, %c0_19] : memref<8x128xf32, #tpu.memory_space<vmem>>, vector<8x128xf32>
      tpu.vector_store %arg5[%c0_18, %c0_19], %36 {strides = array<i32>} : memref<8x128xf32, #tpu.memory_space<vmem>>, vector<8x128xf32>,
    } else {
    }
    %cst = arith.constant 0.000000e+00 : f32
    %3 = vector.broadcast %cst : f32 to vector<8x128xf32>
    %c0 = arith.constant 0 : index
    %c0_1 = arith.constant 0 : index
    %4 = vector.load %arg2[%c0, %c0_1] : memref<8x128xf32, #tpu.memory_space<vmem>>, vector<8x128xf32>
    %c0_2 = arith.constant 0 : index
    %c0_3 = arith.constant 0 : index
    %5 = vector.load %arg3[%c0_2, %c0_3] : memref<8x128xf32, #tpu.memory_space<vmem>>, vector<8x128xf32>
    %c0_4 = arith.constant 0 : index
    %c0_5 = arith.constant 0 : index
    %6 = vector.load %arg4[%c0_4, %c0_5] : memref<8x128xf32, #tpu.memory_space<vmem>>, vector<8x128xf32>
    %7 = math.absf %4 : vector<8x128xf32>
    %cst_6 = arith.constant 0.000000e+00 : f32
    %8 = vector.broadcast %cst_6 : f32 to vector<8x128xf32>
    %9 = arith.subf %8, %7 : vector<8x128xf32>
    %10 = math.exp %9 : vector<8x128xf32>
    %11 = math.absf %5 : vector<8x128xf32>
    %cst_7 = arith.constant 0.000000e+00 : f32
    %12 = vector.broadcast %cst_7 : f32 to vector<8x128xf32>
    %13 = arith.subf %12, %11 : vector<8x128xf32>
    %14 = math.exp %13 : vector<8x128xf32>
    %cst_8 = arith.constant 0.000000e+00 : f32
    %15 = vector.broadcast %cst_8 : f32 to vector<8x128xf32>
    %16 = arith.maximumf %4, %15 : vector<8x128xf32>
    %cst_9 = arith.constant 0.000000e+00 : f32
    %17 = vector.broadcast %cst_9 : f32 to vector<8x128xf32>
    %18 = arith.maximumf %5, %17 : vector<8x128xf32>
    %19 = arith.addf %16, %18 : vector<8x128xf32>
    %20 = arith.addf %4, %5 : vector<8x128xf32>
    %21 = arith.mulf %20, %6 : vector<8x128xf32>
    %22 = arith.subf %19, %21 : vector<8x128xf32>
    %cst_10 = arith.constant 1.000000e+00 : f32
    %23 = vector.broadcast %cst_10 : f32 to vector<8x128xf32>
    %24 = arith.addf %23, %10 : vector<8x128xf32>
    %cst_11 = arith.constant 1.000000e+00 : f32
    %25 = vector.broadcast %cst_11 : f32 to vector<8x128xf32>
    %26 = arith.addf %25, %14 : vector<8x128xf32>
    %27 = arith.mulf %24, %26 : vector<8x128xf32>
    %28 = math.log %27 : vector<8x128xf32>
    %29 = arith.addf %22, %28 : vector<8x128xf32>
    %30 = vector.shape_cast %29 : vector<8x128xf32> to vector<1x8x128xf32>
    %cst_12 = arith.constant dense<0.000000e+00> : vector<8x128xf32>
    %31 = vector.multi_reduction <add>, %30, %cst_12 [0] : vector<1x8x128xf32> to vector<8x128xf32>
    %32 = arith.addf %3, %31 : vector<8x128xf32>
    %c0_13 = arith.constant 0 : index
    %c0_14 = arith.constant 0 : index
    %33 = vector.load %arg5[%c0_13, %c0_14] : memref<8x128xf32, #tpu.memory_space<vmem>>, vector<8x128xf32>
    %34 = arith.addf %33, %32 : vector<8x128xf32>
    %c0_15 = arith.constant 0 : index
    %c0_16 = arith.constant 0 : index
    %35 = vector.load %arg5[%c0_15, %c0_16] : memref<8x128xf32, #tpu.memory_space<vmem>>, vector<8x128xf32>
    tpu.vector_store %arg5[%c0_15, %c0_16], %34 {strides = array<i32>} : memref<8x128xf32, #tpu.memory_space<vmem>>, vector<8x128xf32>,
    return
  }
  func.func @transform_0(%arg0: i32, %arg1: i32) -> (i32, i32) {
    %c1_i32 = arith.constant 1 : i32
    %0 = arith.muli %arg0, %c1_i32 : i32
    %1 = arith.addi %0, %arg1 : i32
    %c0_i32 = arith.constant 0 : i32
    %c0_i32_0 = arith.constant 0 : i32
    return %1, %c0_i32 : i32, i32
  }
  func.func @transform_1(%arg0: i32, %arg1: i32) -> (i32, i32) {
    %c1_i32 = arith.constant 1 : i32
    %0 = arith.muli %arg0, %c1_i32 : i32
    %1 = arith.addi %0, %arg1 : i32
    %c0_i32 = arith.constant 0 : i32
    %c0_i32_0 = arith.constant 0 : i32
    return %1, %c0_i32 : i32, i32
  }
  func.func @transform_2(%arg0: i32, %arg1: i32) -> (i32, i32) {
    %c1_i32 = arith.constant 1 : i32
    %0 = arith.muli %arg0, %c1_i32 : i32
    %1 = arith.addi %0, %arg1 : i32
    %c0_i32 = arith.constant 0 : i32
    %c0_i32_0 = arith.constant 0 : i32
    return %1, %c0_i32 : i32, i32
  }
  func.func @transform_3(%arg0: i32, %arg1: i32) -> (i32, i32) {
    %c0_i32 = arith.constant 0 : i32
    %c0_i32_0 = arith.constant 0 : i32
    return %arg0, %c0_i32 : i32, i32
  }
}

</mosaic_0001>

<bundles_post_ra>
// kernel: tpu_custom_call.1
= control target key start
LH: loop header
LB: loop body
LE: loop exit
PB: predicated region body
PF: predicated region fallthrough
CT: control target
= control target key end

     0   :  { %s942_s0 = inlined_call_operand.hbm [shape: f32[16,128], index: 0, kind: input, shape index: {}]   ;;  %s943_s1 = inlined_call_operand.hbm [shape: f32[16,128], index: 1, kind: input, shape index: {}]   ;;  %s944_s2 = inlined_call_operand.hbm [shape: f32[16,128], index: 2, kind: input, shape index: {}]   ;;  %s945_s3 = inlined_call_operand.hbm [shape: f32[16,128], index: 3, kind: output, shape index: {}]  }
   0x1   :  { %949 = sst [smem:[#allocation14_spill]] %s943_s1 }
   0x2   :  { %8 = vsyncpa [#allocation3], 0 }
   0x3   :  { %10 = vsyncpa [#allocation3 + $0x1], 0 }
   0x4   :  { %11 = vsyncpa [#allocation6], 0 }
   0x5   :  { %13 = vsyncpa [#allocation6 + $0x1], 0 }
   0x6   :  { %14 = vsyncpa [#allocation4], 0 }
   0x7   :  { %16 = vsyncpa [#allocation4 + $0x1], 0  ;;  %s744_s12 = smov 0   ;;  %s746_s13 = smov 0  }
   0x8   :  { %s748_s14 = smov 0   ;;  %s750_s15 = smov 0  }
   0x9   :  { %s752_s16 = smov 0   ;;  %s754_s17 = smov 0  }
   0xa LB: > { %950 = sst [smem:[#allocation12_spill]] %s714_s16  ;;  %s775_s18 = sadd.s32 4294967295, %s718_s17   ;;  %s718_s17 = sphi %s754_s17, %s22_s17   ;;  %s714_s16 = sphi %s752_s16, %s962_s16   ;;  %s710_s15 = sphi %s750_s15, %s961_s15   ;;  %s706_s14 = sphi %s748_s14, %s965_s14   ;;  %s702_s13 = sphi %s746_s13, %s964_s13   ;;  %s698_s12 = sphi %s744_s12, %s963_s12  }
   0xb   : > { %s453_s19 = sadd.s32 4294967294, %s718_s17   ;;  %s34_s20 = sadd.s32 1, %s714_s16 }
   0xc   : > { %s43_s21 = sadd.s32 1, %s706_s14  ;;  %p36_p0 = scmp.ge.s32.totalorder %s34_s20, 2 }
   0xd   : > { %p50_p1 = scmp.ne.s32.totalorder %s706_s14, %s702_s13  ;;  %p51_p2 = scmp.eq.s32.totalorder %s718_s17, 0 }
   0xe   : > { %p56_p3 = scmp.ne.s32.totalorder %s702_s13, %s698_s12  ;;  %s967_s20 = smov (%p36_p0, %s34_s20), 0 }
   0xf   : > { %951 = sst [smem:[#allocation13_spill]] %s967_s20  ;;  %p787_p4 = por %p51_p2, %p50_p1 }
  0x10   : > { %p57_p5 = scmp.eq.s32.totalorder %s775_s18, 0  ;;  %s40_s23 = ssub.s32 %s714_s16, %s967_s20 }
  0x11   : > { %p136_p6 = scmp.eq.s32.totalorder %s775_s18, 1  ;;  %p41_p7 = scmp.eq.s32.totalorder %s40_s23, 0 }
  0x12   : > { %p795_p8 = por %p57_p5, %p56_p3  ;;  %p142_p10 = scmp.eq.s32.totalorder %s453_s19, 1 }
  0x13   : > { %p799_p9 = por %p136_p6, %p50_p1  ;;  %p493_p13 = scmp.lt.s32.totalorder %s718_s17, 2 }
  0x14   : > { %s804_s26 = scalar_select %p41_p7, %s706_s14, %s43_s21  }
  0x15   : > { %p806_p11 = por %p142_p10, %p56_p3  ;;  %s946_s28 = sand.u32 1, %s706_s14  }
  0x16   : > { %s815_s29 = sshll.u32 %s946_s28, 3  ;;  %s818_s30 = sshll.u32 %s714_s16, 7 }
  0x17   : > { %p822_p0 = pnand %p493_p13, %p787_p4  ;;  %s181_s5 = sand.u32 1, %s718_s17  }
  0x18   : > { %s957_s1 = sld [smem:[#allocation14_spill]]  ;;  %s185_s9 = scalar_lea.vmem [#allocation5], %s815_s29 }
  0x19   : > { %s193_s10 = sshll.u32 %s185_s9, 4  ;;  %p462_p1 = scmp.ge.s32.totalorder %s718_s17, 1  ;;  %s194_s10 = int_to_ptr.vmem [resolvable:$true] %s193_s10 }
  0x1a   : > { %p217_p2 = scmp.lt.s32.totalorder %s718_s17, 3  ;;  %s834_s11 = scalar_lea.sflag [#allocation6], %s181_s5 }
  0x1b   : > { %p552_p3 = pneg %p822_p0  ;;  %s563_s19 = scalar_lea.vmem %s194_s10, 128 }
  0x1c   : > { %p564_p4 = scmp.ne.s32.totalorder %s194_s10, %s563_s19  ;;  %s720_s21 = smov [#allocation5]  }
  0x1d   : > { %s568_s22 = sshll.u32 %s720_s21, 4  ;;  %s569_s22 = int_to_ptr.vmem [resolvable:$false] %s568_s22 }
  0x1e   : > { %s191_s8 = scalar_lea.hbm %s957_s1, %s818_s30  ;;  %p566_p5 = pnand %p564_p4, %p552_p3 }
  0x1f   : > { %s570_s23 = scalar_lea.vmem %s569_s22, 256  ;;  %p571_p7 = scmp.lt.s32.totalorder %s194_s10, %s569_s22 }
  0x20   : > { %p567_p6 = pneg %p566_p5  ;;  %p572_p10 = scmp.lt.s32.totalorder %s570_s23, %s563_s19 }
  0x22   : > { %p573_p13 = por %p572_p10, %p571_p7 }
  0x24   : > { %p574_p12 = pnand %p573_p13, %p567_p6 }
  0x26   : > { %577 = shalt.err (!%p574_p12)
}
  0x27   : > { %485 = dma.hbm_to_vmem [thread:$0]  (!%p822_p0), %s191_s8, 128, %s194_s10, %s834_s11  }
  0x28   : > { %p848_p4 = pnand %p462_p1, %p217_p2  ;;  %s172_s9 = scalar_lea.hbm %s942_s0, %s818_s30 }
  0x29   : > { %s166_s19 = scalar_lea.vmem [#allocation2], %s815_s29  ;;  %s210_s28 = scalar_lea.hbm %s944_s2, %s818_s30 }
  0x2a   : > { %s174_s21 = sshll.u32 %s166_s19, 4  ;;  %s959_s1 = sand.u32 1, %s706_s14   ;;  %s175_s21 = int_to_ptr.vmem [resolvable:$true] %s174_s21 }
  0x2b   : > { %s163_s20 = scalar_lea.sflag [#allocation3], %s959_s1  ;;  %s591_s8 = scalar_lea.vmem %s175_s21, 128 }
  0x2c   : > { %p592_p12 = scmp.ne.s32.totalorder %s175_s21, %s591_s8  ;;  %s721_s10 = smov [#allocation2]  }
  0x2d   : > { %s596_s16 = sshll.u32 %s721_s10, 4  ;;  %s597_s16 = int_to_ptr.vmem [resolvable:$false] %s596_s16 }
  0x2e   : > { %p594_p1 = pnand %p592_p12, %p552_p3  ;;  %s598_s6 = scalar_lea.vmem %s597_s16, 256 }
  0x2f   : > { %p599_p5 = scmp.lt.s32.totalorder %s175_s21, %s597_s16  ;;  %p600_p6 = scmp.lt.s32.totalorder %s598_s6, %s591_s8 }
  0x30   : > { %p595_p2 = pneg %p594_p1 }
  0x31   : > { %p601_p7 = por %p600_p6, %p599_p5 }
  0x33   : > { %p602_p10 = pnand %p601_p7, %p595_p2 }
  0x35   : > { %605 = shalt.err (!%p602_p10)
}
  0x36   : > { %482 = dma.hbm_to_vmem [thread:$0]  (!%p822_p0), %s172_s9, 128, %s175_s21, %s163_s20  }
  0x37   : > { %s204_s1 = scalar_lea.vmem [#allocation7], %s815_s29  ;;  %s722_s22 = smov [#allocation7]  }
  0x38   : > { %s212_s7 = sshll.u32 %s204_s1, 4  ;;  %s624_s16 = sshll.u32 %s722_s22, 4  ;;  %s213_s7 = int_to_ptr.vmem [resolvable:$true] %s212_s7  ;;  %s625_s16 = int_to_ptr.vmem [resolvable:$false] %s624_s16 }
  0x39   : > { %s619_s19 = scalar_lea.vmem %s213_s7, 128  ;;  %s626_s23 = scalar_lea.vmem %s625_s16, 256 }
  0x3a   : > { %p620_p13 = scmp.ne.s32.totalorder %s213_s7, %s619_s19  ;;  %p627_p2 = scmp.lt.s32.totalorder %s213_s7, %s625_s16 }
  0x3b   : > { %p628_p5 = scmp.lt.s32.totalorder %s626_s23, %s619_s19 }
  0x3c   : > { %p622_p12 = pnand %p620_p13, %p552_p3 }
  0x3d   : > { %p629_p6 = por %p628_p5, %p627_p2 }
  0x3e   : > { %p623_p1 = pneg %p622_p12 }
  0x40   : > { %p630_p7 = pnand %p629_p6, %p623_p1 }
  0x42   : > { %633 = shalt.err (!%p630_p7)
}
  0x43   : > { %488 = dma.hbm_to_vmem [thread:$0]  (!%p822_p0), %s210_s28, 128, %s213_s7, %s834_s11  }
  0x44   : > { %221 = sbr.rel (%p848_p4) target bundleno = 134 (0x86), region = 32  ;;  %s883_s9 = sand.u32 (!%p848_p4), 1, %s702_s13  }
  0x45   : > { %s886_s21 = sshll.u32 (!%p848_p4), %s883_s9, 3  ;;  %s224_s4 = scalar_lea.sflag (!%p848_p4), [#allocation3], %s883_s9 }
  0x46   : > { %s227_s8 = scalar_lea.vmem (!%p848_p4), [#allocation2], %s886_s21 }
  0x49   : > { %685 = dma.done.wait (%p795_p8), %s224_s4, 128  }
  0x4a   : > { %687 = vsyncadd (%p795_p8), %s224_s4, 4294967168  ;;  %s232_s28 = sand.u32 1, %s775_s18   ;;  %s236_s11 = scalar_lea.vmem [#allocation5], %s886_s21 }
  0x4b   : > { %s233_s30 = scalar_lea.sflag [#allocation6], %s232_s28 }
  0x4c   : > { %689 = dma.done.wait (%p795_p8), %s233_s30, 256  }
  0x4d   : > { %691 = vsyncadd (%p795_p8), %s233_s30, 4294967040  ;;  %v286_v0 = vld [vmem:[%s227_s8] sm:$0xff]  ;;  %v287_v1 = vld [vmem:[%s236_s11] sm:$0xff]  ;;  %s245_s18 = scalar_lea.vmem [#allocation7], %s886_s21  ;;  %s468_s24 = sshll.u32 %s710_s15, 7 }
  0x4e   : > { %v289_v2 = vand.u32 2147483647, %v286_v0  ;;  %v293_v3 = vand.u32 2147483647, %v287_v1  ;;  %v297_v13 = vmax.f32 %v286_v0, 0.0  ;;  %v298_v14 = vmax.f32 %v287_v1, 0.0  ;;  %s326_s7 = scalar_lea.hbm %s945_s3, %s468_s24 }
  0x4f   : > { %v300_v15 = vadd.f32 %v287_v1, %v286_v0  ;;  %v288_v16 = vld [vmem:[%s245_s18] sm:$0xff]  ;;  %s277_s5 = scalar_lea.vmem [#allocation8], %s886_s21  ;;  %s315_s19 = scalar_lea.sflag [#allocation4], %s883_s9 }
  0x50   : > { %v290_v4 = vsub.f32 0.0, %v289_v2  ;;  %v294_v5 = vsub.f32 0.0, %v293_v3  ;;  %v299_v17 = vadd.f32 %v298_v14, %v297_v13  ;;  %s328_s10 = sshll.u32 %s277_s5, 4  ;;  %s723_s16 = smov [#allocation8]   ;;  %s329_s10 = int_to_ptr.vmem [resolvable:$true] %s328_s10 }
  0x51   : > { %v301_v18 = vmul.f32 %v300_v15, %v288_v16  ;;  %s634_s22 = scalar_lea.vmem %s329_s10, 128  ;;  %s638_s23 = sshll.u32 %s723_s16, 4  ;;  %s639_s23 = int_to_ptr.vmem [resolvable:$false] %s638_s23 }
  0x52   : > { %v291_v6 = vmul.f32 1.442695, %v290_v4  ;;  %v295_v7 = vmul.f32 1.442695, %v294_v5  ;;  %p635_p8 = scmp.ne.s32.totalorder %s329_s10, %s634_s22  ;;  %s640_s20 = scalar_lea.vmem %s639_s23, 256 }
  0x53   : > { %v302_v19 = vsub.f32 %v299_v17, %v301_v18  ;;  %p641_p4 = scmp.lt.s32.totalorder %s329_s10, %s639_s23  ;;  %p642_p10 = scmp.lt.s32.totalorder %s640_s20, %s634_s22 }
  0x54   : > { %544 = vpow2.f32 %v291_v6  ;;  %p636_p0 = pnand %p635_p8, %p799_p9 }
  0x55   : > { %546 = vpow2.f32 %v295_v7  ;;  %p643_p13 = por %p642_p10, %p641_p4 }
  0x56   : > { %p637_p3 = pneg %p636_p0 }
  0x58   : > { %p644_p12 = pnand %p643_p13, %p637_p3 }
  0x61   : > { %v545_v8 = vpop.eup %544 }
  0x62   : > { %v547_v9 = vpop.eup %546  ;;  %v303_v10 = vadd.f32 1.0, %v545_v8 }
  0x63   : > { %v304_v11 = vadd.f32 1.0, %v547_v9 }
  0x65   : > { %v305_v12 = vmul.f32 %v304_v11, %v303_v10 }
  0x67   : > { %548 = vlog2.f32 %v305_v12 }
  0x74   : > { %v549_v20 = vpop.eup %548 }
  0x75   : > { %v307_v21 = vmul.f32 0.6931472, %v549_v20 }
  0x77   : > { %v308_v22 = vadd.f32 %v307_v21, %v302_v19 }
  0x79   : > { %313 = vst [vmem:[%s277_s5] sm:$0xff] %v308_v22 }
  0x7a   : > { %647 = shalt.err (!%p644_p12)
}
  0x7b   : > { %s648_s15 = scalar_lea.hbm %s326_s7, 128  ;;  %s652_s21 = scalar_lea.hbm %s945_s3, 256 }
  0x7c   : > { %p649_p1 = scmp.ne.s32.totalorder %s326_s7, %s648_s15  ;;  %p653_p6 = scmp.lt.s32.totalorder %s326_s7, %s945_s3 }
  0x7d   : > { %p654_p7 = scmp.lt.s32.totalorder %s652_s21, %s648_s15 }
  0x7e   : > { %p650_p2 = pnand %p649_p1, %p799_p9 }
  0x7f   : > { %p655_p8 = por %p654_p7, %p653_p6 }
  0x80   : > { %p651_p5 = pneg %p650_p2 }
  0x82   : > { %p656_p0 = pnand %p655_p8, %p651_p5 }
  0x84   : > { %659 = shalt.err (!%p656_p0)
}
  0x85   : > { %477 = dma.vmem_to_hbm [thread:$0]  (%p799_p9), %s329_s10, 128, %s326_s7, %s315_s19  }
  0x86 PF: > { %s340_s28 = sand.u32 1, %s698_s12   ;;  %p960_p3 = scmp.ge.s32.totalorder %s718_s17, 2 }
  0x87   : > { %s341_s30 = scalar_lea.sflag [#allocation4], %s340_s28 }
  0x88   : > { %p490_p4 = pnand %p960_p3, %p806_p11 }
  0x8a   : > { %p491_p10 = pneg %p490_p4 }
  0x8c   : > { %693 = dma.done.wait (%p491_p10), %s341_s30, 128  }
  0x8d   : > { %695 = vsyncadd (%p491_p10), %s341_s30, 4294967168  ;;  %s22_s17 = sadd.s32 1, %s718_s17   ;;  %s961_s15 = sld [smem:[#allocation12_spill]] }
  0x8e   : > { %p19_p13 = scmp.ge.s32.totalorder %s22_s17, 4   ;;  %s962_s16 = sld [smem:[#allocation13_spill]] }
  0x8f   : > { %s963_s12 = smov %s702_s13  ;;  %s964_s13 = smov %s706_s14 }
  0x90   : > { %s965_s14 = smov %s804_s26  ;;  %21 = sbr.rel (!%p19_p13) target bundleno = 10 (0xa), region = 105 }
  0x95   :  { %346 = vsyncpa [#allocation3], 1 }
  0x96   :  { %348 = vsyncpa [#allocation3 + $0x1], 1 }
  0x97   :  { %349 = vsyncpa [#allocation6], 1 }
  0x98   :  { %351 = vsyncpa [#allocation6 + $0x1], 1 }
  0x99   :  { %352 = vsyncpa [#allocation4], 1 }
  0x9a   :  { %354 = vsyncpa [#allocation4 + $0x1], 1 }

</bundles_post_ra>
